<compile_context>
chip_gen: v7x
topology: tpu7x:2x2x1
jax: 0.10.0
libtpu: 0.0.40
codegen_flags: <defaults>
</compile_context>

<pallas_src>
import functools

import jax
import jax.numpy as jnp
from jax.experimental import pallas as pl
from jax.experimental.pallas import tpu as pltpu


def _scale_rows_kernel(scale_ref, x_ref, o_ref):
    # scale_ref: (rows, 1) f32 ; x_ref / o_ref: (rows, l_tile) in x.dtype.
    # scale is 0 for dropped channels, 1/(1-p) for kept ones (constant along L).
    o_ref[...] = (x_ref[...].astype(jnp.float32) * scale_ref[...]).astype(o_ref.dtype)


def _vmem_plan():
    """(per-block byte budget, scoped-VMEM limit) co-designed with this chip's VMEM."""
    try:
        info = pltpu.get_tpu_info()
        phys = int(getattr(info, "vmem_capacity_bytes", 64 * 1024 * 1024))
    except Exception:
        phys = 64 * 1024 * 1024  # assume the smallest (v7x: 64 MiB per TensorCore)
    limit = max(16 * 1024 * 1024, min(64 * 1024 * 1024, phys // 2))
    # 2 double-buffered streams (x tile + out tile) => ~4x block bytes per step (+ tiny scale).
    tile = min(4 * 1024 * 1024, limit // 6)
    return tile, limit


def _plan_tiles(rows_total, length, itemsize, tile_bytes):
    """Pick (rows_per_tile, l_tile) under tile_bytes with native sublane/lane alignment."""
    sub = max(8, (8 * 4) // itemsize)            # 8 f32, 16 bf16/f16, 32 int8/fp8
    min_rows = min(rows_total, sub)
    row_bytes = length * itemsize
    if min_rows * row_bytes <= tile_bytes:
        rows = max(sub, (tile_bytes // row_bytes) // sub * sub)
        if rows >= rows_total:
            rows = rows_total                     # full extent: always a legal block shape
        l_tile = length
    else:
        rows = min_rows
        l_tile = max(128, (tile_bytes // max(1, rows * itemsize)) // 128 * 128)
        if l_tile >= length:
            l_tile = length
    return rows, l_tile


@functools.partial(
    jax.jit, static_argnames=("p", "in_place", "core_parallel", "tile_bytes"))
def _dropout_channels_impl(x, key, *, p, in_place, core_parallel, tile_bytes):
    N, C, L = x.shape
    R = N * C
    itemsize = jnp.dtype(x.dtype).itemsize

    # Per-(n, c) keep mask and pre-folded f32 scale (tiny: R values, computed once in XLA).
    keep = jax.random.bernoulli(key, 1.0 - p, (R, 1))
    scale = jnp.where(keep, jnp.float32(1.0 / (1.0 - p)), jnp.float32(0.0))

    if L < 128:
        # Lane-starved output (masked vst, <50% lane occupancy): a fused XLA multiply beats a
        # standalone Pallas call here.  Identical math.
        out = x.astype(jnp.float32) * scale.reshape(N, C, 1)
        return out.astype(x.dtype)

    x2d = x.reshape(R, L)

    auto_tile, vmem_limit = _vmem_plan()
    budget = tile_bytes if tile_bytes is not None else auto_tile
    rows_per_tile, l_tile = _plan_tiles(R, L, itemsize, budget)
    grid = (pl.cdiv(R, rows_per_tile), pl.cdiv(L, l_tile))

    # Row axis: CORE_PARALLEL shards rows across v7x's 2 TensorCores (plain "parallel" does
    # not); harmless on single-core chips.  Guarded so missing enums just use strings.
    if core_parallel and hasattr(pltpu, "CORE_PARALLEL") and hasattr(pltpu, "ARBITRARY"):
        dim_sem = (pltpu.CORE_PARALLEL, pltpu.ARBITRARY)
    else:
        dim_sem = ("parallel", "arbitrary")

    out2d = pl.pallas_call(
        _scale_rows_kernel,
        out_shape=jax.ShapeDtypeStruct((R, L), x.dtype),
        grid=grid,
        in_specs=[
            pl.BlockSpec((rows_per_tile, 1), lambda i, l: (i, 0)),       # per-channel scale
            pl.BlockSpec((rows_per_tile, l_tile), lambda i, l: (i, l)),  # x tile
        ],
        out_specs=pl.BlockSpec((rows_per_tile, l_tile), lambda i, l: (i, l)),
        compiler_params=pltpu.CompilerParams(
            dimension_semantics=dim_sem,
            vmem_limit_bytes=vmem_limit,
        ),
        input_output_aliases=({1: 0} if in_place else {}),
    )(scale, x2d)

    return out2d.reshape(N, C, L)


def dropout_time_series_channels(x, key, p=0.5, training=True, in_place=False,
                                 _tile_bytes=None):
    """Channel dropout for x: (N, C, L). Matches nn.Dropout2d applied on (N, C, 1, L)."""
    if not training or p == 0.0:
        return x
    p = float(p)
    if p >= 1.0:
        return jnp.zeros_like(x)
    kwargs = dict(p=p, in_place=bool(in_place), tile_bytes=_tile_bytes)
    try:
        return _dropout_channels_impl(x, key, core_parallel=True, **kwargs)
    except Exception:
        # CORE_PARALLEL semantics unsupported on this chip / jax / grid shape ->
        # recompile with plain "parallel" semantics (identical results).
        return _dropout_channels_impl(x, key, core_parallel=False, **kwargs)


if __name__ == "__main__":
    import numpy as np

    def check_channel_dropout(x, out, p, rtol, atol):
        x_np = np.array(jnp.asarray(x, jnp.float32))
        out_np = np.array(jnp.asarray(out, jnp.float32))
        scale = 1.0 / (1.0 - p)
        for n in range(x_np.shape[0]):
            for c in range(x_np.shape[1]):
                ch = out_np[n, c]
                if np.all(ch == 0.0):
                    continue  # dropped channel
                np.testing.assert_allclose(ch, x_np[n, c] * scale, rtol=rtol, atol=atol)

    root = jax.random.PRNGKey(0)
    data_key, drop_key, data_key2, drop_key2 = jax.random.split(root, 4)

    # Test 1: small f32 series, single block.
    N, C, L, p = 2, 4, 128, 0.5
    x = jax.random.normal(data_key, (N, C, L), dtype=jnp.float32)
    out = jax.block_until_ready(dropout_time_series_channels(x, drop_key, p=p, training=True))
    assert out.shape == x.shape and out.dtype == x.dtype
    check_channel_dropout(x, out, p, rtol=1e-5, atol=1e-5)

    # Test 2: bf16 with a tiny forced block budget -> exercises the 2-D (row, L) tiling path.
    N2, C2, L2, p2 = 2, 16, 256, 0.25
    x2 = jax.random.normal(data_key2, (N2, C2, L2), dtype=jnp.bfloat16)
    out2 = jax.block_until_ready(
        dropout_time_series_channels(x2, drop_key2, p=p2, training=True, _tile_bytes=4096))
    assert out2.shape == x2.shape and out2.dtype == x2.dtype
    check_channel_dropout(x2, out2, p2, rtol=2e-2, atol=2e-2)

    # Eval / p=0 paths are identity.
    same = dropout_time_series_channels(x, drop_key, p=p, training=False)
    assert np.allclose(np.array(same), np.array(x))
    same0 = dropout_time_series_channels(x, drop_key, p=0.0, training=True)
    assert np.allclose(np.array(same0), np.array(x))

    print("KERNEL_OK")
</pallas_src>

<mosaic_0001>
module attributes {stable_mosaic.version = 11 : i64} {
  func.func @_scale_rows_kernel(%arg0: i32, %arg1: i32, %arg2: memref<8x1xf32, #tpu.memory_space<vmem>>, %arg3: memref<8x128xf32, #tpu.memory_space<vmem>>, %arg4: memref<8x128xf32, #tpu.memory_space<vmem>>) attributes {dimension_semantics = [#tpu.dimension_semantics<core_parallel>, #tpu.dimension_semantics<arbitrary>], iteration_bounds = array<i64: 1, 1>, scalar_prefetch = 0 : i64, scratch_operands = 0 : i64, tpu.core_type = #tpu.core_type<tc>, window_params = [{transform_indices = @transform_0, window_bounds = array<i64: 8, 1>}, {transform_indices = @transform_1, window_bounds = array<i64: 8, 128>}, {transform_indices = @transform_2, window_bounds = array<i64: 8, 128>}]} {
    %c0 = arith.constant 0 : index
    %c0_0 = arith.constant 0 : index
    %0 = vector.load %arg3[%c0, %c0_0] : memref<8x128xf32, #tpu.memory_space<vmem>>, vector<8x128xf32>
    %c0_1 = arith.constant 0 : index
    %c0_2 = arith.constant 0 : index
    %1 = vector.load %arg2[%c0_1, %c0_2] : memref<8x1xf32, #tpu.memory_space<vmem>>, vector<8x1xf32>
    %2 = vector.broadcast %1 : vector<8x1xf32> to vector<8x128xf32>
    %3 = arith.mulf %0, %2 : vector<8x128xf32>
    %c0_3 = arith.constant 0 : index
    %c0_4 = arith.constant 0 : index
    %4 = vector.load %arg4[%c0_3, %c0_4] : memref<8x128xf32, #tpu.memory_space<vmem>>, vector<8x128xf32>
    tpu.vector_store %arg4[%c0_3, %c0_4], %3 {strides = array<i32>} : memref<8x128xf32, #tpu.memory_space<vmem>>, vector<8x128xf32>,
    return
  }
  func.func @transform_0(%arg0: i32, %arg1: i32) -> (i32, i32) {
    %c0_i32 = arith.constant 0 : i32
    %c0_i32_0 = arith.constant 0 : i32
    return %arg0, %c0_i32 : i32, i32
  }
  func.func @transform_1(%arg0: i32, %arg1: i32) -> (i32, i32) {
    %c0_i32 = arith.constant 0 : i32
    return %arg0, %arg1 : i32, i32
  }
  func.func @transform_2(%arg0: i32, %arg1: i32) -> (i32, i32) {
    %c0_i32 = arith.constant 0 : i32
    return %arg0, %arg1 : i32, i32
  }
}

module attributes {stable_mosaic.version = 11 : i64} {
  func.func @_scale_rows_kernel(%arg0: i32, %arg1: i32, %arg2: memref<8x1xf32, #tpu.memory_space<vmem>>, %arg3: memref<8x128xf32, #tpu.memory_space<vmem>>, %arg4: memref<8x128xf32, #tpu.memory_space<vmem>>) attributes {dimension_semantics = [#tpu.dimension_semantics<parallel>, #tpu.dimension_semantics<arbitrary>], iteration_bounds = array<i64: 1, 1>, scalar_prefetch = 0 : i64, scratch_operands = 0 : i64, tpu.core_type = #tpu.core_type<tc>, window_params = [{transform_indices = @transform_0, window_bounds = array<i64: 8, 1>}, {transform_indices = @transform_1, window_bounds = array<i64: 8, 128>}, {transform_indices = @transform_2, window_bounds = array<i64: 8, 128>}]} {
    %c0 = arith.constant 0 : index
    %c0_0 = arith.constant 0 : index
    %0 = vector.load %arg3[%c0, %c0_0] : memref<8x128xf32, #tpu.memory_space<vmem>>, vector<8x128xf32>
    %c0_1 = arith.constant 0 : index
    %c0_2 = arith.constant 0 : index
    %1 = vector.load %arg2[%c0_1, %c0_2] : memref<8x1xf32, #tpu.memory_space<vmem>>, vector<8x1xf32>
    %2 = vector.broadcast %1 : vector<8x1xf32> to vector<8x128xf32>
    %3 = arith.mulf %0, %2 : vector<8x128xf32>
    %c0_3 = arith.constant 0 : index
    %c0_4 = arith.constant 0 : index
    %4 = vector.load %arg4[%c0_3, %c0_4] : memref<8x128xf32, #tpu.memory_space<vmem>>, vector<8x128xf32>
    tpu.vector_store %arg4[%c0_3, %c0_4], %3 {strides = array<i32>} : memref<8x128xf32, #tpu.memory_space<vmem>>, vector<8x128xf32>,
    return
  }
  func.func @transform_0(%arg0: i32, %arg1: i32) -> (i32, i32) {
    %c0_i32 = arith.constant 0 : i32
    %c0_i32_0 = arith.constant 0 : i32
    return %arg0, %c0_i32 : i32, i32
  }
  func.func @transform_1(%arg0: i32, %arg1: i32) -> (i32, i32) {
    %c0_i32 = arith.constant 0 : i32
    return %arg0, %arg1 : i32, i32
  }
  func.func @transform_2(%arg0: i32, %arg1: i32) -> (i32, i32) {
    %c0_i32 = arith.constant 0 : i32
    return %arg0, %arg1 : i32, i32
  }
}

</mosaic_0001>

<bundles_post_ra>
// kernel: _dropout_channels_impl.1
= control target key start
LH: loop header
LB: loop body
LE: loop exit
PB: predicated region body
PF: predicated region fallthrough
CT: control target
= control target key end

     0   :  { %s3_s9 = sld [smem:[#allocation0]]   ;;  %s139_s0 = inlined_call_operand.vmem [shape: f32[8,1], index: 0, kind: input, shape index: {}]   ;;  %s140_s1 = inlined_call_operand.vmem [shape: f32[8,128], index: 1, kind: input, shape index: {}]   ;;  %s141_s2 = inlined_call_operand.hbm [shape: f32[8,128], index: 2, kind: output, shape index: {}]  }
   0x1   :  { %7 = vsyncpa [#allocation3], 0  ;;  %v107_v0 = vmov 0   ;;  %v37_v1 = vld [vmem:[%s139_s0] sm:$0xff]  ;;  %s108_s15 = smov [#allocation2]  }
   0x2   :  { %80 = vset.pattern.permute.xlu0 %v107_v0  ;;  %v36_v2 = vld [vmem:[%s140_s1] sm:$0xff]  ;;  %s53_s16 = sshll.u32 %s108_s15, 4  ;;  %s54_s16 = int_to_ptr.vmem [resolvable:$true] %s53_s16 }
   0x3   :  { %40 = vperm.xlu0 %80, %v37_v1   ;;  %s81_s20 = scalar_lea.vmem %s54_s16, 128  ;;  %p86_p1 = scmp.lt.s32.totalorder %s54_s16, %s54_s16 }
   0x4   :  { %p82_p0 = scmp.ne.s32.totalorder %s54_s16, %s81_s20  ;;  %p87_p2 = scmp.lt.s32.totalorder %s81_s20, %s81_s20 }
   0x6   :  { %s77_s14 = sshll.u32 %s3_s9, 7  ;;  %p88_p3 = por %p87_p2, %p86_p1 }
   0x7   :  { %s51_s19 = scalar_lea.hbm %s141_s2, %s77_s14 }
   0x8   :  { %p89_p4 = pnand %p88_p3, %p82_p0 }
  0x82   :  { %v41_v3 = vpop.permute.xlu0 %40 }
  0x83   :  { %v43_v4 = vmul.f32 %v41_v3, %v36_v2 }
  0x85   :  { %44 = vst [vmem:[#allocation2] sm:$0xff] %v43_v4 }
  0x86   :  { %92 = shalt.err (!%p89_p4)
}
  0x87   :  { %s93_s0 = scalar_lea.hbm %s51_s19, 128  ;;  %s95_s22 = scalar_lea.hbm %s141_s2, 128 }
  0x88   :  { %p94_p5 = scmp.ne.s32.totalorder %s51_s19, %s93_s0  ;;  %p96_p6 = scmp.lt.u32.totalorder %s51_s19, %s141_s2 }
  0x89   :  { %p97_p7 = scmp.lt.u32.totalorder %s95_s22, %s93_s0  ;;  %p99_p9 = scmp.lt.u32.totalorder %s93_s0, %s51_s19 }
  0x8b   :  { %p98_p8 = por %p97_p7, %p96_p6 }
  0x8d   :  { %p100_p10 = por %p99_p9, %p98_p8 }
  0x8f   :  { %p101_p11 = pnand %p100_p10, %p94_p5 }
  0x91   :  { %104 = shalt.err (!%p101_p11)
}
  0x92   :  { %56 = dma.vmem_to_hbm [thread:$0]  %s54_s16, 128, %s51_s19, [#allocation3]  }
  0x93   :  { %105 = dma.done.wait [#allocation3], 128  }
  0x94   :  { %106 = vsyncadd [#allocation3], 4294967168 }
  0x95   :  { %60 = vsyncpa [#allocation3], 1 }

// kernel: _dropout_channels_impl.1
= control target key start
LH: loop header
LB: loop body
LE: loop exit
PB: predicated region body
PF: predicated region fallthrough
CT: control target
= control target key end

     0   :  { %s97_s0 = inlined_call_operand.vmem [shape: f32[8,1], index: 0, kind: input, shape index: {}]   ;;  %s98_s1 = inlined_call_operand.vmem [shape: f32[8,128], index: 1, kind: input, shape index: {}]   ;;  %s99_s2 = inlined_call_operand.hbm [shape: f32[8,128], index: 2, kind: output, shape index: {}]  }
   0x1   :  { %v13_v0 = vld [vmem:[%s97_s0] sm:$0xff] }
   0x2   :  { %7 = vsyncpa [#allocation3], 0  ;;  %v62_v1 = vmov 0   ;;  %v12_v2 = vld [vmem:[%s98_s1] sm:$0xff]  ;;  %s63_s13 = smov [#allocation2]  }
   0x3   :  { %37 = vset.pattern.permute.xlu0 %v62_v1  ;;  %s27_s14 = sshll.u32 %s63_s13, 4  ;;  %s28_s14 = int_to_ptr.vmem [resolvable:$true] %s27_s14 }
   0x4   :  { %16 = vperm.xlu0 %37, %v13_v0   ;;  %s38_s15 = scalar_lea.vmem %s28_s14, 128  ;;  %p43_p1 = scmp.lt.s32.totalorder %s28_s14, %s28_s14 }
   0x5   :  { %p39_p0 = scmp.ne.s32.totalorder %s28_s14, %s38_s15  ;;  %p44_p2 = scmp.lt.s32.totalorder %s38_s15, %s38_s15 }
   0x7   :  { %p45_p3 = por %p44_p2, %p43_p1 }
   0x9   :  { %p46_p4 = pnand %p45_p3, %p39_p0 }
  0x83   :  { %v17_v3 = vpop.permute.xlu0 %16 }
  0x84   :  { %v19_v4 = vmul.f32 %v17_v3, %v12_v2 }
  0x86   :  { %20 = vst [vmem:[#allocation2] sm:$0xff] %v19_v4 }
  0x87   :  { %49 = shalt.err (!%p46_p4)
}
  0x88   :  { %s50_s17 = scalar_lea.hbm %s99_s2, 128 }
  0x89   :  { %p51_p5 = scmp.ne.s32.totalorder %s99_s2, %s50_s17  ;;  %p54_p6 = scmp.lt.u32.totalorder %s50_s17, %s99_s2 }
  0x8b   :  { %p56_p7 = pnand %p54_p6, %p51_p5 }
  0x8d   :  { %59 = shalt.err (!%p56_p7)
}
  0x8e   :  { %30 = dma.vmem_to_hbm [thread:$0]  %s28_s14, 128, %s99_s2, [#allocation3]  }
  0x8f   :  { %60 = dma.done.wait [#allocation3], 128  }
  0x90   :  { %61 = vsyncadd [#allocation3], 4294967168 }
  0x91   :  { %34 = vsyncpa [#allocation3], 1 }

</bundles_post_ra>
